<compile_context>
chip_gen: v7x
topology: tpu7x:2x2x1
jax: 0.10.0
libtpu: 0.0.40
codegen_flags: <defaults>
</compile_context>

<pallas_src>
import functools

import jax
import jax.numpy as jnp
from jax import lax
from jax.experimental import pallas as pl
from jax.experimental.pallas import tpu as pltpu


def _flash_attn_kernel(q_ref, k_ref, v_ref, o_ref,
                       q_sc, vaug_sc, m_sc, acc_sc,
                       *, scale, mxu_dtype, mask_len, approx_recip):
    """One (batch, head-group, q-tile, kv-tile) grid step.

    q_ref: (Hb, C, TQ)     k_ref / v_ref: (Hb, C, TKV)     o_ref: (Hb, C, TQ)
    q_sc:    (Hb, C, TQ)   pre-scaled q in the MXU feed dtype
    vaug_sc: (Hb, C+1, TKV) V with an appended row of ones
    m_sc:    (Hb, 1, TQ) f32 running max
    acc_sc:  (Hb, C+1, TQ) f32 unnormalized output; last row = softmax denom l
    """
    ki = pl.program_id(3)
    Hb, C, TKV = v_ref.shape

    @pl.when(ki == 0)
    def _init():
        # Full softmax scale (C^-1/2) folded into a single multiply on q, done
        # once per q-tile (not once per KV step), then cast to the MXU dtype.
        q_sc[...] = (q_ref[...].astype(jnp.float32) * scale).astype(mxu_dtype)
        # Ones row only needs (re)writing once per q-tile: rows [0, C) are
        # refreshed every KV step below and never touch row C.
        vaug_sc[:, C:, :] = jnp.ones((Hb, 1, TKV), mxu_dtype)
        m_sc[...] = jnp.full_like(m_sc, -jnp.inf)
        acc_sc[...] = jnp.zeros_like(acc_sc)

    # Stage V (cast to the MXU dtype).  The appended ones row makes the PV
    # matmul also emit sum_s p[s, t] as its last output row, so the softmax
    # denominator needs no separate VPU reduction pass over the (TKV, TQ) tile.
    vaug_sc[:, :C, :] = v_ref[...].astype(mxu_dtype)

    q = q_sc[...]                       # (Hb, C, TQ)
    k = k_ref[...].astype(mxu_dtype)    # (Hb, C, TKV)

    # scores[h, s, t] = sum_c k[h, c, s] * q[h, c, t]  -- no in-kernel transpose.
    s = lax.dot_general(k, q, (((1,), (1,)), ((0,), (0,))),
                        preferred_element_type=jnp.float32)      # (Hb, TKV, TQ)

    if mask_len is not None:
        # Keys in [mask_len, T_pad) are zero padding -> mask them out.  Every
        # KV tile keeps >= 1 real key (pad < 128 <= TKV) so m_new stays finite.
        kv_ids = ki * TKV + lax.broadcasted_iota(jnp.int32, (1, TKV, 1), 1)
        s = jnp.where(kv_ids < mask_len, s, -1e30)

    m_prev = m_sc[...]                                            # (Hb, 1, TQ)
    m_new = jnp.maximum(m_prev, jnp.max(s, axis=1, keepdims=True))
    alpha = jnp.exp(m_prev - m_new)                               # (Hb, 1, TQ)
    p = jnp.exp(s - m_new).astype(mxu_dtype)     # single exp -> MXU feed dtype

    # One MXU matmul updates both the unnormalized output (rows 0..C-1) and
    # the softmax denominator (row C); the alpha rescale covers both at once.
    acc_sc[...] = alpha * acc_sc[...] + lax.dot_general(
        vaug_sc[...], p, (((2,), (1,)), ((0,), (0,))),
        preferred_element_type=jnp.float32)                       # (Hb, C+1, TQ)
    m_sc[...] = m_new

    @pl.when(ki == pl.num_programs(3) - 1)
    def _finalize():
        # Deferred normalization: only Hb*TQ reciprocals, on the EUP.
        inv_l = pl.reciprocal(acc_sc[:, C:, :], approx=approx_recip)  # (Hb,1,TQ)
        o_ref[...] = (acc_sc[:, :C, :] * inv_l).astype(o_ref.dtype)


def _round_up(x, m):
    return ((x + m - 1) // m) * m


def _pick_tile(total_pad, target):
    """Largest multiple of 128 that divides `total_pad` and is <= target.

    `total_pad` is always a multiple of 128, so 128 is a valid floor: there is
    no "full extent" fallback and hence never a (T, T) score slab."""
    target = max(128, (int(target) // 128) * 128)
    best = 128
    t = 256
    while t <= min(target, total_pad):
        if total_pad % t == 0:
            best = t
        t += 128
    return best


def _pick_head_group(n_heads, C, TQ, TKV, batch, n_q):
    """How many heads to fold into one grid step.

    Amortizes per-step overhead when C is small, bounded by a budget on the
    (Hb, TKV, TQ) score-tile intermediates, and keeps >= 2 units of parallel
    grid work so the 2-TensorCore v7x megacore is not left half idle."""
    score_budget = 2 * 1024 * 1024      # elements (f32 s + bf16 p ~ 12-16 MiB)
    best = 1
    for hb in range(1, n_heads + 1):
        if n_heads % hb:
            continue
        if hb > 1 and (hb * C > 512 or hb * TKV * TQ > score_budget):
            continue
        best = hb
    while best > 1 and batch * (n_heads // best) * n_q < 2:
        best = max(d for d in range(1, best) if n_heads % d == 0)
    return best


def _vmem_limit_bytes():
    """Generation-aware scoped-VMEM budget (v7x only has 64 MiB per core)."""
    cap = 64 * 1024 * 1024
    try:
        cap = int(pltpu.get_tpu_info().vmem_capacity_bytes)
    except Exception:   # conservative fallback (also covers interpret mode)
        pass
    return int(max(32 * 1024 * 1024,
                   min(cap - 16 * 1024 * 1024, 112 * 1024 * 1024)))


def attention_pallas(qkv, n_heads, *, block_q=512, block_kv=1024,
                     use_bf16_mxu=True):
    """qkv: (B, 3*H*C, *spatial). Returns (B, H*C, *spatial)."""
    B = qkv.shape[0]
    width = qkv.shape[1]
    spatial = qkv.shape[2:]
    assert width % (3 * n_heads) == 0, (width, n_heads)
    C = width // (3 * n_heads)
    T = 1
    for d in spatial:
        T *= int(d)

    # Pure reshape of the channel axis -> (B, 3, H, C, T); no HBM transpose.
    x = qkv.reshape(B, 3, n_heads, C, T)

    T_pad = _round_up(T, 128)
    TQ = _pick_tile(T_pad, block_q)
    TKV = _pick_tile(T_pad, block_kv)
    if T_pad != T:
        # One mem-bound zero-pad pass; padded keys are masked in-kernel and
        # padded query columns are sliced off below.
        x = jnp.pad(x, ((0, 0), (0, 0), (0, 0), (0, 0), (0, T_pad - T)))
    n_q = T_pad // TQ
    n_kv = T_pad // TKV

    Hb = _pick_head_group(n_heads, C, TQ, TKV, B, n_q)
    n_groups = n_heads // Hb

    scale = float(C) ** (-0.5)          # C^{-1/4} on q and k folded into one
    mxu_dtype = jnp.bfloat16 if use_bf16_mxu else qkv.dtype
    kernel = functools.partial(
        _flash_attn_kernel, scale=scale, mxu_dtype=mxu_dtype,
        mask_len=(T if T_pad != T else None), approx_recip=use_bf16_mxu)

    # x dims: (B, qkv, H, C, T_pad). q/k/v selected by fixing the qkv axis.
    q_spec = pl.BlockSpec((None, None, Hb, C, TQ),
                          lambda b, g, qi, ki: (b, 0, g, 0, qi))
    k_spec = pl.BlockSpec((None, None, Hb, C, TKV),
                          lambda b, g, qi, ki: (b, 1, g, 0, ki))
    v_spec = pl.BlockSpec((None, None, Hb, C, TKV),
                          lambda b, g, qi, ki: (b, 2, g, 0, ki))
    # Output stays (Hb, C, TQ): last dim is the sequence axis -> lane-dense.
    o_spec = pl.BlockSpec((None, Hb, C, TQ),
                          lambda b, g, qi, ki: (b, g, 0, qi))

    # TODO(synk): if profiling on v5e shows exposed K/V DMA at large TKV, add
    # pipeline_mode=pl.Buffered(3) to k_spec/v_spec.
    out = pl.pallas_call(
        kernel,
        out_shape=jax.ShapeDtypeStruct((B, n_heads, C, T_pad), qkv.dtype),
        grid_spec=pltpu.PrefetchScalarGridSpec(
            num_scalar_prefetch=0,
            grid=(B, n_groups, n_q, n_kv),
            in_specs=[q_spec, k_spec, v_spec],
            out_specs=o_spec,
            scratch_shapes=[
                pltpu.VMEM((Hb, C, TQ), mxu_dtype),         # pre-scaled q
                pltpu.VMEM((Hb, C + 1, TKV), mxu_dtype),    # V + ones row
                pltpu.VMEM((Hb, 1, TQ), jnp.float32),       # running max m
                pltpu.VMEM((Hb, C + 1, TQ), jnp.float32),   # acc (+ l in row C)
            ],
        ),
        compiler_params=pltpu.CompilerParams(
            dimension_semantics=("parallel", "parallel", "parallel", "arbitrary"),
            vmem_limit_bytes=_vmem_limit_bytes(),
        ),
    )(x, x, x)   # same HBM buffer three times; BlockSpecs pick q/k/v slabs

    if T_pad != T:
        out = out[..., :T]
    return out.reshape(B, n_heads * C, *spatial)


def attention_reference(qkv, n_heads):
    """Pure-JAX reference mirroring the PyTorch module."""
    B = qkv.shape[0]
    width = qkv.shape[1]
    spatial = qkv.shape[2:]
    C = width // (3 * n_heads)
    T = 1
    for d in spatial:
        T *= int(d)
    x = qkv.reshape(B, width, T)
    q, k, v = jnp.split(x, 3, axis=1)
    scale = float(C) ** (-1.0 / 4.0)
    q = (q * scale).reshape(B * n_heads, C, T)
    k = (k * scale).reshape(B * n_heads, C, T)
    v = v.reshape(B * n_heads, C, T)
    w = jnp.einsum("bct,bcs->bts", q, k)
    w = jax.nn.softmax(w.astype(jnp.float32), axis=-1).astype(w.dtype)
    out = jnp.einsum("bts,bcs->bct", w, v)
    return out.reshape(B, n_heads * C, *spatial)


if __name__ == "__main__":
    key = jax.random.PRNGKey(0)

    # Test 1: exact f32 path, T = 256 (no padding), small tiles so the
    # multi-KV online-softmax path and head batching are both exercised.
    B, H, C, S = 2, 2, 8, 16
    qkv1 = jax.random.normal(key, (B, 3 * H * C, S, S), dtype=jnp.float32)
    out1 = attention_pallas(qkv1, H, block_q=128, block_kv=128,
                            use_bf16_mxu=False)
    out1 = jax.block_until_ready(out1)
    ref1 = attention_reference(qkv1, H)
    assert out1.shape == (B, H * C, S, S), out1.shape
    err1 = float(jnp.max(jnp.abs(out1 - ref1)))
    assert err1 < 1e-4, err1

    # Test 2: production bf16-MXU path with T = 400 (not a multiple of 128):
    # exercises the zero-pad + masked-key tail, multi-KV tiles, head batching
    # and the approx reciprocal.  Looser tolerance because of bf16 feeding.
    B2, H2, C2, S2 = 2, 4, 8, 20
    qkv2 = jax.random.normal(jax.random.PRNGKey(1),
                             (B2, 3 * H2 * C2, S2, S2), dtype=jnp.float32)
    out2 = attention_pallas(qkv2, H2, block_q=128, block_kv=256,
                            use_bf16_mxu=True)
    out2 = jax.block_until_ready(out2)
    ref2 = attention_reference(qkv2, H2)
    assert out2.shape == (B2, H2 * C2, S2, S2), out2.shape
    err2 = float(jnp.max(jnp.abs(out2 - ref2)))
    assert err2 < 5e-2, err2

    print("KERNEL_OK")
</pallas_src>

<mosaic_0001>
module attributes {stable_mosaic.version = 11 : i64} {
  func.func @_flash_attn_kernel(%arg0: i32, %arg1: i32, %arg2: i32, %arg3: i32, %arg4: memref<1x1x2x8x128xf32, #tpu.memory_space<vmem>>, %arg5: memref<1x1x2x8x128xf32, #tpu.memory_space<vmem>>, %arg6: memref<1x1x2x8x128xf32, #tpu.memory_space<vmem>>, %arg7: memref<1x2x8x128xf32, #tpu.memory_space<vmem>>, %arg8: memref<2x8x128xf32, #tpu.memory_space<vmem>>, %arg9: memref<2x9x128xf32, #tpu.memory_space<vmem>>, %arg10: memref<2x1x128xf32, #tpu.memory_space<vmem>>, %arg11: memref<2x9x128xf32, #tpu.memory_space<vmem>>) attributes {dimension_semantics = [#tpu.dimension_semantics<parallel>, #tpu.dimension_semantics<parallel>, #tpu.dimension_semantics<parallel>, #tpu.dimension_semantics<arbitrary>], iteration_bounds = array<i64: 2, 1, 2, 2>, scalar_prefetch = 0 : i64, scratch_operands = 4 : i64, tpu.core_type = #tpu.core_type<tc>, window_params = [{transform_indices = @transform_0, window_bounds = array<i64: 1, 1, 2, 8, 128>}, {transform_indices = @transform_1, window_bounds = array<i64: 1, 1, 2, 8, 128>}, {transform_indices = @transform_2, window_bounds = array<i64: 1, 1, 2, 8, 128>}, {transform_indices = @transform_3, window_bounds = array<i64: 1, 2, 8, 128>}]} {
    %c0_i32 = arith.constant 0 : i32
    %0 = arith.cmpi eq, %arg3, %c0_i32 : i32
    %1 = arith.extui %0 : i1 to i32
    %c0_i32_0 = arith.constant 0 : i32
    %2 = arith.cmpi ne, %1, %c0_i32_0 : i32
    scf.if %2 {
      %c0_34 = arith.constant 0 : index
      %c0_35 = arith.constant 0 : index
      %c0_36 = arith.constant 0 : index
      %c0_37 = arith.constant 0 : index
      %c0_38 = arith.constant 0 : index
      %30 = vector.load %arg4[%c0_34, %c0_35, %c0_36, %c0_37, %c0_38] : memref<1x1x2x8x128xf32, #tpu.memory_space<vmem>>, vector<1x1x2x8x128xf32>
      %31 = vector.shape_cast %30 : vector<1x1x2x8x128xf32> to vector<2x8x128xf32>
      %cst_39 = arith.constant 0.353553385 : f32
      %32 = vector.broadcast %cst_39 : f32 to vector<2x8x128xf32>
      %33 = arith.mulf %31, %32 : vector<2x8x128xf32>
      %c0_40 = arith.constant 0 : index
      %c0_41 = arith.constant 0 : index
      %c0_42 = arith.constant 0 : index
      %34 = vector.load %arg8[%c0_40, %c0_41, %c0_42] : memref<2x8x128xf32, #tpu.memory_space<vmem>>, vector<2x8x128xf32>
      tpu.vector_store %arg8[%c0_40, %c0_41, %c0_42], %33 {strides = array<i32>} : memref<2x8x128xf32, #tpu.memory_space<vmem>>, vector<2x8x128xf32>,
      %cst_43 = arith.constant 1.000000e+00 : f32
      %35 = vector.broadcast %cst_43 : f32 to vector<2x1x128xf32>
      %c0_44 = arith.constant 0 : index
      %c8 = arith.constant 8 : index
      %c0_45 = arith.constant 0 : index
      %36 = vector.load %arg9[%c0_44, %c8, %c0_45] : memref<2x9x128xf32, #tpu.memory_space<vmem>>, vector<2x1x128xf32>
      tpu.vector_store %arg9[%c0_44, %c8, %c0_45], %35 {strides = array<i32>} : memref<2x9x128xf32, #tpu.memory_space<vmem>>, vector<2x1x128xf32>,
      %cst_46 = arith.constant 0xFF800000 : f32
      %37 = vector.broadcast %cst_46 : f32 to vector<2x1x128xf32>
      %c0_47 = arith.constant 0 : index
      %c0_48 = arith.constant 0 : index
      %c0_49 = arith.constant 0 : index
      %38 = vector.load %arg10[%c0_47, %c0_48, %c0_49] : memref<2x1x128xf32, #tpu.memory_space<vmem>>, vector<2x1x128xf32>
      tpu.vector_store %arg10[%c0_47, %c0_48, %c0_49], %37 {strides = array<i32>} : memref<2x1x128xf32, #tpu.memory_space<vmem>>, vector<2x1x128xf32>,
      %cst_50 = arith.constant 0.000000e+00 : f32
      %39 = vector.broadcast %cst_50 : f32 to vector<2x9x128xf32>
      %c0_51 = arith.constant 0 : index
      %c0_52 = arith.constant 0 : index
      %c0_53 = arith.constant 0 : index
      %40 = vector.load %arg11[%c0_51, %c0_52, %c0_53] : memref<2x9x128xf32, #tpu.memory_space<vmem>>, vector<2x9x128xf32>
      tpu.vector_store %arg11[%c0_51, %c0_52, %c0_53], %39 {strides = array<i32>} : memref<2x9x128xf32, #tpu.memory_space<vmem>>, vector<2x9x128xf32>,
    } else {
    }
    %c0 = arith.constant 0 : index
    %c0_1 = arith.constant 0 : index
    %c0_2 = arith.constant 0 : index
    %c0_3 = arith.constant 0 : index
    %c0_4 = arith.constant 0 : index
    %3 = vector.load %arg6[%c0, %c0_1, %c0_2, %c0_3, %c0_4] : memref<1x1x2x8x128xf32, #tpu.memory_space<vmem>>, vector<1x1x2x8x128xf32>
    %4 = vector.shape_cast %3 : vector<1x1x2x8x128xf32> to vector<2x8x128xf32>
    %c0_5 = arith.constant 0 : index
    %c0_6 = arith.constant 0 : index
    %c0_7 = arith.constant 0 : index
    %5 = vector.load %arg9[%c0_5, %c0_6, %c0_7] : memref<2x9x128xf32, #tpu.memory_space<vmem>>, vector<2x8x128xf32>
    tpu.vector_store %arg9[%c0_5, %c0_6, %c0_7], %4 {strides = array<i32>} : memref<2x9x128xf32, #tpu.memory_space<vmem>>, vector<2x8x128xf32>,
    %c0_8 = arith.constant 0 : index
    %c0_9 = arith.constant 0 : index
    %c0_10 = arith.constant 0 : index
    %6 = vector.load %arg8[%c0_8, %c0_9, %c0_10] : memref<2x8x128xf32, #tpu.memory_space<vmem>>, vector<2x8x128xf32>
    %c0_11 = arith.constant 0 : index
    %c0_12 = arith.constant 0 : index
    %c0_13 = arith.constant 0 : index
    %c0_14 = arith.constant 0 : index
    %c0_15 = arith.constant 0 : index
    %7 = vector.load %arg5[%c0_11, %c0_12, %c0_13, %c0_14, %c0_15] : memref<1x1x2x8x128xf32, #tpu.memory_space<vmem>>, vector<1x1x2x8x128xf32>
    %8 = vector.shape_cast %7 : vector<1x1x2x8x128xf32> to vector<2x8x128xf32>
    %cst = arith.constant dense<0.000000e+00> : vector<2x128x128xf32>
    %9 = tpu.matmul %8, %6, %cst {dimension_numbers = #tpu.dot_dimension_numbers<[1], [1], [2], [2], [0, 0, 0, 2, 1, 2], [0], [0]>} : vector<2x8x128xf32>, vector<2x8x128xf32>, vector<2x128x128xf32> -> vector<2x128x128xf32>
    %c0_16 = arith.constant 0 : index
    %c0_17 = arith.constant 0 : index
    %c0_18 = arith.constant 0 : index
    %10 = vector.load %arg10[%c0_16, %c0_17, %c0_18] : memref<2x1x128xf32, #tpu.memory_space<vmem>>, vector<2x1x128xf32>
    %cst_19 = arith.constant dense<0xFF800000> : vector<2x128xf32>
    %11 = vector.multi_reduction <maximumf>, %9, %cst_19 [1] : vector<2x128x128xf32> to vector<2x128xf32>
    %12 = vector.shape_cast %11 : vector<2x128xf32> to vector<2x1x128xf32>
    %13 = arith.maximumf %10, %12 : vector<2x1x128xf32>
    %14 = arith.subf %10, %13 : vector<2x1x128xf32>
    %15 = math.exp %14 : vector<2x1x128xf32>
    %16 = vector.broadcast %13 : vector<2x1x128xf32> to vector<2x128x128xf32>
    %17 = arith.subf %9, %16 : vector<2x128x128xf32>
    %18 = math.exp %17 : vector<2x128x128xf32>
    %c0_20 = arith.constant 0 : index
    %c0_21 = arith.constant 0 : index
    %c0_22 = arith.constant 0 : index
    %19 = vector.load %arg11[%c0_20, %c0_21, %c0_22] : memref<2x9x128xf32, #tpu.memory_space<vmem>>, vector<2x9x128xf32>
    %20 = vector.broadcast %15 : vector<2x1x128xf32> to vector<2x9x128xf32>
    %21 = arith.mulf %20, %19 : vector<2x9x128xf32>
    %c0_23 = arith.constant 0 : index
    %c0_24 = arith.constant 0 : index
    %c0_25 = arith.constant 0 : index
    %22 = vector.load %arg9[%c0_23, %c0_24, %c0_25] : memref<2x9x128xf32, #tpu.memory_space<vmem>>, vector<2x9x128xf32>
    %cst_26 = arith.constant dense<0.000000e+00> : vector<2x9x128xf32>
    %23 = tpu.matmul %22, %18, %cst_26 {dimension_numbers = #tpu.dot_dimension_numbers<[2], [1], [1], [2], [0, 0, 0, 1, 1, 2], [0], [0]>} : vector<2x9x128xf32>, vector<2x128x128xf32>, vector<2x9x128xf32> -> vector<2x9x128xf32>
    %24 = arith.addf %21, %23 : vector<2x9x128xf32>
    %c0_27 = arith.constant 0 : index
    %c0_28 = arith.constant 0 : index
    %c0_29 = arith.constant 0 : index
    %25 = vector.load %arg11[%c0_27, %c0_28, %c0_29] : memref<2x9x128xf32, #tpu.memory_space<vmem>>, vector<2x9x128xf32>
    tpu.vector_store %arg11[%c0_27, %c0_28, %c0_29], %24 {strides = array<i32>} : memref<2x9x128xf32, #tpu.memory_space<vmem>>, vector<2x9x128xf32>,
    %c0_30 = arith.constant 0 : index
    %c0_31 = arith.constant 0 : index
    %c0_32 = arith.constant 0 : index
    %26 = vector.load %arg10[%c0_30, %c0_31, %c0_32] : memref<2x1x128xf32, #tpu.memory_space<vmem>>, vector<2x1x128xf32>
    tpu.vector_store %arg10[%c0_30, %c0_31, %c0_32], %13 {strides = array<i32>} : memref<2x1x128xf32, #tpu.memory_space<vmem>>, vector<2x1x128xf32>,
    %c1_i32 = arith.constant 1 : i32
    %27 = arith.cmpi eq, %arg3, %c1_i32 : i32
    %28 = arith.extui %27 : i1 to i32
    %c0_i32_33 = arith.constant 0 : i32
    %29 = arith.cmpi ne, %28, %c0_i32_33 : i32
    scf.if %29 {
      %c0_34 = arith.constant 0 : index
      %c8 = arith.constant 8 : index
      %c0_35 = arith.constant 0 : index
      %30 = vector.load %arg11[%c0_34, %c8, %c0_35] : memref<2x9x128xf32, #tpu.memory_space<vmem>>, vector<2x1x128xf32>
      %31 = tpu.reciprocal %30 : vector<2x1x128xf32> -> vector<2x1x128xf32>
      %c0_36 = arith.constant 0 : index
      %c0_37 = arith.constant 0 : index
      %c0_38 = arith.constant 0 : index
      %32 = vector.load %arg11[%c0_36, %c0_37, %c0_38] : memref<2x9x128xf32, #tpu.memory_space<vmem>>, vector<2x8x128xf32>
      %33 = vector.broadcast %31 : vector<2x1x128xf32> to vector<2x8x128xf32>
      %34 = arith.mulf %32, %33 : vector<2x8x128xf32>
      %c0_39 = arith.constant 0 : index
      %c0_40 = arith.constant 0 : index
      %c0_41 = arith.constant 0 : index
      %c0_42 = arith.constant 0 : index
      %35 = vector.load %arg7[%c0_39, %c0_40, %c0_41, %c0_42] : memref<1x2x8x128xf32, #tpu.memory_space<vmem>>, vector<1x2x8x128xf32>
      %36 = vector.shape_cast %35 : vector<1x2x8x128xf32> to vector<2x8x128xf32>
      %37 = vector.shape_cast %34 : vector<2x8x128xf32> to vector<1x2x8x128xf32>
      tpu.vector_store %arg7[%c0_39, %c0_40, %c0_41, %c0_42], %37 {strides = array<i32>} : memref<1x2x8x128xf32, #tpu.memory_space<vmem>>, vector<1x2x8x128xf32>,
    } else {
    }
    return
  }
  func.func @transform_0(%arg0: i32, %arg1: i32, %arg2: i32, %arg3: i32) -> (i32, i32, i32, i32, i32) {
    %c0_i32 = arith.constant 0 : i32
    %c0_i32_0 = arith.constant 0 : i32
    %c0_i32_1 = arith.constant 0 : i32
    return %arg0, %c0_i32, %arg1, %c0_i32_0, %arg2 : i32, i32, i32, i32, i32
  }
  func.func @transform_1(%arg0: i32, %arg1: i32, %arg2: i32, %arg3: i32) -> (i32, i32, i32, i32, i32) {
    %c1_i32 = arith.constant 1 : i32
    %c0_i32 = arith.constant 0 : i32
    %c0_i32_0 = arith.constant 0 : i32
    return %arg0, %c1_i32, %arg1, %c0_i32, %arg3 : i32, i32, i32, i32, i32
  }
  func.func @transform_2(%arg0: i32, %arg1: i32, %arg2: i32, %arg3: i32) -> (i32, i32, i32, i32, i32) {
    %c2_i32 = arith.constant 2 : i32
    %c0_i32 = arith.constant 0 : i32
    %c0_i32_0 = arith.constant 0 : i32
    return %arg0, %c2_i32, %arg1, %c0_i32, %arg3 : i32, i32, i32, i32, i32
  }
  func.func @transform_3(%arg0: i32, %arg1: i32, %arg2: i32, %arg3: i32) -> (i32, i32, i32, i32) {
    %c0_i32 = arith.constant 0 : i32
    %c0_i32_0 = arith.constant 0 : i32
    return %arg0, %arg1, %c0_i32, %arg2 : i32, i32, i32, i32
  }
}

</mosaic_0001>

<bundles_post_ra>
// kernel: tpu_custom_call.1
= control target key start
LH: loop header
LB: loop body
LE: loop exit
PB: predicated region body
PF: predicated region fallthrough
CT: control target
= control target key end

     0   :  { %s2737_s0 = inlined_call_operand.hbm [shape: f32[2,3,2,8,256], index: 0, kind: input, shape index: {}]   ;;  %s2738_s1 = inlined_call_operand.hbm [shape: f32[2,3,2,8,256], index: 1, kind: input, shape index: {}]   ;;  %s2739_s2 = inlined_call_operand.hbm [shape: f32[2,3,2,8,256], index: 2, kind: input, shape index: {}]   ;;  %s2740_s3 = inlined_call_operand.hbm [shape: f32[2,2,8,256], index: 3, kind: output, shape index: {}]  }
   0x1   :  { %2771 = sst [smem:[#allocation31_spill]] %s2738_s1 }
   0x2   :  { %2772 = sst [smem:[#allocation32_spill]] %s2740_s3 }
   0x3   :  { %8 = vsyncpa [#allocation7], 0 }
   0x4   :  { %10 = vsyncpa [#allocation7 + $0x1], 0 }
   0x5   :  { %11 = vsyncpa [#allocation10], 0 }
   0x6   :  { %13 = vsyncpa [#allocation10 + $0x1], 0 }
   0x7   :  { %14 = vsyncpa [#allocation8], 0 }
   0x8   :  { %16 = vsyncpa [#allocation8 + $0x1], 0  ;;  %s2131_s12 = smov 0   ;;  %s2133_s13 = smov 0  }
   0x9   :  { %s2135_s14 = smov 0   ;;  %s2137_s15 = smov 0  }
   0xa   :  { %s2139_s16 = smov 0   ;;  %s2141_s17 = smov 0  }
   0xb   :  { %s2143_s18 = smov 0   ;;  %s2145_s19 = smov 0  }
   0xc   :  { %s2147_s20 = smov 0   ;;  %s2149_s21 = smov 0  }
   0xd   :  { %s2151_s22 = smov 0   ;;  %s2153_s23 = smov 0  }
   0xe   :  { %s2155_s24 = smov 0  }
   0xf LB: > { %2773 = sst [smem:[#allocation16_spill]] %s2052_s13  ;;  %s2195_s25 = sadd.s32 4294967295, %s2096_s24   ;;  %s2096_s24 = sphi %s2155_s24, %s22_s24   ;;  %s2092_s23 = sphi %s2153_s23, %s2835_s23   ;;  %s2088_s22 = sphi %s2151_s22, %s2842_s22   ;;  %s2084_s21 = sphi %s2149_s21, %s2841_s21   ;;  %s2080_s20 = sphi %s2147_s20, %s2833_s20   ;;  %s2076_s19 = sphi %s2145_s19, %s2832_s19   ;;  %s2072_s18 = sphi %s2143_s18, %s2840_s18   ;;  %s2068_s17 = sphi %s2141_s17, %s2839_s17   ;;  %s2064_s16 = sphi %s2139_s16, %s2838_s16   ;;  %s2060_s15 = sphi %s2137_s15, %s2831_s15   ;;  %s2056_s14 = sphi %s2135_s14, %s2837_s14   ;;  %s2052_s13 = sphi %s2133_s13, %s2836_s13   ;;  %s2048_s12 = sphi %s2131_s12, %s2830_s12  }
  0x10   : > { %2774 = sst [smem:[#allocation17_spill]] %s2060_s15  ;;  %s37_s26 = sadd.s32 1, %s2084_s21 }
  0x11   : > { %2775 = sst [smem:[#allocation18_spill]] %s2064_s16  ;;  %p2198_p0 = scmp.ge.s32.totalorder %s37_s26, 2 }
  0x12   : > { %2776 = sst [smem:[#allocation19_spill]] %s2072_s18  ;;  %p2745_p1 = scmp.eq.s32.totalorder %s2096_s24, 0 }
  0x13   : > { %2777 = sst [smem:[#allocation20_spill]] %s2076_s19  ;;  %p2744_p2 = scmp.eq.s32.totalorder %s2195_s25, 0 }
  0x14   : > { %2778 = sst [smem:[#allocation21_spill]] %s2080_s20  ;;  %s2844_s26 = smov (%p2198_p0, %s37_s26), 0 }
  0x15   : > { %2779 = sst [smem:[#allocation22_spill]] %s2088_s22  ;;  %p96_p3 = scmp.ne.s32.totalorder %s2056_s14, %s2052_s13 }
  0x16   : > { %2780 = sst [smem:[#allocation23_spill]] %s2092_s23  ;;  %p102_p4 = scmp.ne.s32.totalorder %s2052_s13, %s2048_s12 }
  0x17   : > { %2781 = sst [smem:[#allocation24_spill]] %s2195_s25  ;;  %p2217_p5 = por %p96_p3, %p2745_p1 }
  0x18   : > { %p2223_p6 = por %p102_p4, %p2744_p2  ;;  %p2743_p7 = scmp.lt.s32.totalorder %s2096_s24, 8 }
  0x19   : > { %s2742_s6 = smul.u32 12, %s2092_s23  ;;  %s211_s7 = sand.u32 1, %s2096_s24  }
  0x1a   : > { %s2784_s5 = scalar_select %p2223_p6, 1, 0 }
  0x1b   : > { %s213_s8 = sand.u32 1, %s2056_s14   ;;  %s1232_s10 = sadd.s32 %s2084_s21, %s2742_s6 }
  0x1c   : > { %2785 = sst [smem:[#allocation25_spill]] %s2784_s5  ;;  %s2231_s9 = sshll.u32 %s213_s8, 4 }
  0x1d   : > { %s1348_s11 = sshll.u32 %s1232_s10, 7  ;;  %s215_s12 = scalar_lea.vmem [#allocation9], %s2231_s9 }
  0x1e   : > { %s227_s29 = sshll.u32 %s215_s12, 4  ;;  %s2786_s1 = sld [smem:[#allocation31_spill]]  ;;  %s2240_s29 = int_to_ptr.vmem [resolvable:$true] %s227_s29 }
  0x1f   : > { %p2248_p8 = pnand %p2743_p7, %p2217_p5  ;;  %s2255_s28 = scalar_lea.hbm %s2739_s2, %s1348_s11 }
  0x20   : > { %s2258_s30 = scalar_lea.hbm %s2255_s28, 1024  ;;  %s2260_s12 = scalar_lea.sflag [#allocation10], %s211_s7 }
  0x21   : > { %p1864_p10 = pneg %p2248_p8 }
  0x24   : > { %s1234_s3 = scalar_lea.hbm %s2786_s1, %s1348_s11  ;;  %s1867_s6 = scalar_lea.hbm %s2786_s1, 3072 }
  0x25   : > { %s2242_s19 = scalar_lea.hbm %s1234_s3, 512  ;;  %s1892_s4 = scalar_lea.hbm %s1234_s3, 768 }
  0x26   : > { %p1863_p9 = scmp.ne.s32.totalorder %s2242_s19, %s1892_s4  ;;  %p1868_p13 = scmp.lt.u32.totalorder %s2242_s19, %s2786_s1 }
  0x27   : > { %p1869_p3 = scmp.lt.u32.totalorder %s1867_s6, %s1892_s4  ;;  %p1871_p5 = scmp.lt.u32.totalorder %s1892_s4, %s2242_s19 }
  0x28   : > { %p1865_p11 = pnand %p1864_p10, %p1863_p9 }
  0x29   : > { %p1870_p4 = por %p1869_p3, %p1868_p13 }
  0x2a   : > { %p1866_p12 = pneg %p1865_p11 }
  0x2b   : > { %p1872_p7 = por %p1871_p5, %p1870_p4 }
  0x2d   : > { %p1873_p2 = pnand %p1872_p7, %p1866_p12 }
  0x2f   : > { %1876 = shalt.err (!%p1873_p2)
}
  0x30   : > { %s1877_s3 = scalar_lea.vmem %s2240_s29, 256  ;;  %s2098_s18 = smov [#allocation9]  }
  0x31   : > { %p1878_p9 = scmp.ne.s32.totalorder %s2240_s29, %s1877_s3  ;;  %s1882_s20 = sshll.u32 %s2098_s18, 4  ;;  %s1883_s20 = int_to_ptr.vmem [resolvable:$false] %s1882_s20 }
  0x32   : > { %s1884_s7 = scalar_lea.vmem %s1883_s20, 512  ;;  %p1885_p6 = scmp.lt.s32.totalorder %s2240_s29, %s1883_s20 }
  0x33   : > { %p1880_p11 = pnand %p1878_p9, %p1864_p10  ;;  %p1886_p13 = scmp.lt.s32.totalorder %s1884_s7, %s1877_s3 }
  0x35   : > { %p1881_p1 = pneg %p1880_p11  ;;  %p1887_p3 = por %p1886_p13, %p1885_p6 }
  0x37   : > { %p1888_p4 = pnand %p1887_p3, %p1881_p1 }
  0x39   : > { %1891 = shalt.err (!%p1888_p4)
}
  0x3a   : > { %s2747_s4 = smov 256   ;;  %s2749_s6 = smov 128  }
  0x3b   : > { %s2751_s10 = smov 8   ;;  %s241_s11 = scalar_lea.vmem [#allocation11], %s2231_s9 }
  0x3c   : > { %1666 = dma.hbm_to_vmem [thread:$0]  (!%p2248_p8), %s2242_s19, 256, %s2240_s29, %s2260_s12, %s2747_s4, %s2749_s6, %s2751_s10  }
  0x3d   : > { %s253_s3 = sshll.u32 %s241_s11, 4  ;;  %p1351_p1 = scmp.ge.s32.totalorder %s2096_s24, 1  ;;  %s2292_s3 = int_to_ptr.vmem [resolvable:$true] %s253_s3 }
  0x3e   : > { %p261_p2 = scmp.lt.s32.totalorder %s2096_s24, 9  ;;  %s1342_s20 = sadd.s32 4294967294, %s2096_s24  }
  0x3f   : > { %s40_s7 = sadd.s32 1, %s2088_s22  ;;  %s59_s19 = sadd.s32 1, %s2068_s17 }
  0x40   : > { %p2295_p6 = pnand %p1351_p1, %p261_p2  ;;  %s2846_s7 = smov (!%p2198_p0, %s40_s7), %s2088_s22 }
  0x41   : > { %p66_p7 = scmp.ne.s32.totalorder %s2068_s17, %s2064_s16  ;;  %p72_p12 = scmp.ne.s32.totalorder %s2064_s16, %s2060_s15 }
  0x42   : > { %s2788_s18 = scalar_select %p2295_p6, 1, 0 }
  0x43   : > { %p42_p5 = scmp.ge.s32.totalorder %s2846_s7, 2  ;;  %p160_p9 = scmp.eq.s32.totalorder %s2195_s25, 7 }
  0x44   : > { %p2789_p11 = scmp.eq.s32.totalorder %s2096_s24, 0  ;;  %p2791_p3 = scmp.eq.s32.totalorder %s2195_s25, 0 }
  0x45   : > { %s2848_s7 = smov (%p42_p5, %s2846_s7), 0  ;;  %s2795_s9 = sadd.s32 1, %s2092_s23 }
  0x46   : > { %p2312_p13 = por %p2789_p11, %p66_p7  ;;  %p2321_p4 = por %p2791_p3, %p72_p12 }
  0x47   : > { %2794 = sst [smem:[#allocation27_spill]] %s2848_s7  ;;  %s2850_s9 = smov (!%p42_p5, %s2795_s9), %s2092_s23 }
  0x48   : > { %s2792_s27 = scalar_select %p2321_p4, 1, 0 }
  0x49   : > { %s55_s11 = ssub.s32 %s2088_s22, %s2848_s7  ;;  %p2332_p0 = por %p160_p9, %p66_p7 }
  0x4a   : > { %2793 = sst [smem:[#allocation26_spill]] %s2792_s27  ;;  %p50_p1 = scmp.ge.s32.totalorder %s2850_s9, 2 }
  0x4b   : > { %s2796_s4 = scalar_select %p2332_p0, 1, 0 }
  0x4c   : > { %p166_p2 = scmp.eq.s32.totalorder %s1342_s20, 7  ;;  %s2768_s6 = sand.u32 1, %s2068_s17  }
  0x4d   : > { %2797 = sst [smem:[#allocation28_spill]] %s2796_s4  ;;  %s2798_s10 = smul.u32 12, %s2092_s23 }
  0x4e   : > { %s2852_s9 = smov (%p50_p1, %s2850_s9), 0  ;;  %p2345_p5 = por %p166_p2, %p72_p12 }
  0x4f   : > { %s198_s1 = sadd.s32 %s2088_s22, %s2798_s10  ;;  %2799 = sst [smem:[#allocation29_spill]] %s2852_s9 }
  0x50   : > { %s2800_s7 = scalar_select %p2345_p5, 1, 0 }
  0x51   : > { %s52_s5 = ssub.s32 %s2092_s23, %s2852_s9  ;;  %s1345_s4 = sshll.u32 %s2768_s6, 4 }
  0x52   : > { %2801 = sst [smem:[#allocation30_spill]] %s2800_s7  ;;  %s56_s20 = sor.u32 %s55_s11, %s52_s5 }
  0x53   : > { %s2802_s13 = ssub.s32 %s2084_s21, %s2844_s26  ;;  %p57_p7 = scmp.eq.s32.totalorder %s56_s20, 0 }
  0x54   : > { %s86_s25 = sor.u32 %s2802_s13, %s52_s5  ;;  %s1346_s10 = sshll.u32 %s198_s1, 7 }
  0x55   : > { %p87_p9 = scmp.eq.s32.totalorder %s86_s25, 0  ;;  %s2803_s15 = sadd.s32 1, %s2056_s14 }
  0x56   : > { %s2357_s22 = scalar_select %p57_p7, %s2068_s17, %s59_s19  }
  0x57   : > { %s2362_s27 = scalar_select %p87_p9, %s2056_s14, %s2803_s15  }
  0x58   : > { %s2367_s9 = scalar_lea.hbm %s2737_s0, %s1346_s10  ;;  %s190_s23 = scalar_lea.vmem [#allocation6], %s1345_s4 }
  0x59   : > { %s201_s6 = sshll.u32 %s190_s23, 4  ;;  %p2804_p12 = scmp.lt.s32.totalorder %s2096_s24, 8  ;;  %s2369_s6 = int_to_ptr.vmem [resolvable:$true] %s201_s6 }
  0x5a   : > { %s1923_s1 = scalar_lea.hbm %s2255_s28, 1280  ;;  %s1898_s25 = scalar_lea.hbm %s2739_s2, 3072 }
  0x5b   : > { %p2375_p11 = pnand %p2804_p12, %p2312_p13  ;;  %p1894_p3 = scmp.ne.s32.totalorder %s2258_s30, %s1923_s1 }
  0x5c   : > { %p1899_p7 = scmp.lt.u32.totalorder %s2258_s30, %s2739_s2  ;;  %p1900_p9 = scmp.lt.u32.totalorder %s1898_s25, %s1923_s1 }
  0x5d   : > { %p1896_p1 = pnand %p1894_p3, %p1864_p10  ;;  %p1902_p13 = scmp.lt.u32.totalorder %s1923_s1, %s2258_s30 }
  0x5e   : > { %p1901_p5 = por %p1900_p9, %p1899_p7 }
  0x5f   : > { %p1897_p2 = pneg %p1896_p1 }
  0x60   : > { %p1903_p12 = por %p1902_p13, %p1901_p5 }
  0x62   : > { %p1904_p0 = pnand %p1903_p12, %p1897_p2 }
  0x64   : > { %1907 = shalt.err (!%p1904_p0)
}
  0x65   : > { %s1908_s28 = scalar_lea.vmem %s2292_s3, 256  ;;  %s2102_s4 = smov [#allocation11]  }
  0x66   : > { %p1909_p3 = scmp.ne.s32.totalorder %s2292_s3, %s1908_s28  ;;  %s1913_s7 = sshll.u32 %s2102_s4, 4  ;;  %s1914_s7 = int_to_ptr.vmem [resolvable:$false] %s1913_s7 }
  0x67   : > { %s1915_s19 = scalar_lea.vmem %s1914_s7, 512  ;;  %p1916_p6 = scmp.lt.s32.totalorder %s2292_s3, %s1914_s7 }
  0x68   : > { %p1911_p1 = pnand %p1909_p3, %p1864_p10  ;;  %p1917_p7 = scmp.lt.s32.totalorder %s1915_s19, %s1908_s28 }
  0x6a   : > { %p1912_p4 = pneg %p1911_p1  ;;  %p1918_p9 = por %p1917_p7, %p1916_p6 }
  0x6c   : > { %p1919_p5 = pnand %p1918_p9, %p1912_p4 }
  0x6e   : > { %1922 = shalt.err (!%p1919_p5)
}
  0x6f   : > { %s2806_s29 = smov 8   ;;  %s2807_s11 = smov 128  }
  0x70   : > { %s2808_s20 = smov 256   ;;  %s2809_s10 = sand.u32 1, %s2068_s17  }
  0x71   : > { %1669 = dma.hbm_to_vmem [thread:$0]  (!%p2248_p8), %s2258_s30, 256, %s2292_s3, %s2260_s12, %s2808_s20, %s2807_s11, %s2806_s29  }
  0x72   : > { %s2408_s1 = scalar_lea.sflag [#allocation7], %s2809_s10  ;;  %s1924_s15 = scalar_lea.hbm %s2367_s9, 256 }
  0x73   : > { %p1925_p10 = scmp.ne.s32.totalorder %s2367_s9, %s1924_s15  ;;  %p1926_p6 = pneg %p2375_p11 }
  0x74   : > { %s1929_s25 = scalar_lea.hbm %s2737_s0, 3072  ;;  %p1930_p2 = scmp.lt.u32.totalorder %s2367_s9, %s2737_s0 }
  0x75   : > { %p1927_p4 = pnand %p1926_p6, %p1925_p10  ;;  %p1931_p8 = scmp.lt.u32.totalorder %s1929_s25, %s1924_s15 }
  0x76   : > { %p1933_p12 = scmp.lt.u32.totalorder %s1924_s15, %s2367_s9 }
  0x77   : > { %p1928_p0 = pneg %p1927_p4  ;;  %p1932_p13 = por %p1931_p8, %p1930_p2 }
  0x79   : > { %p1934_p3 = por %p1933_p12, %p1932_p13 }
  0x7b   : > { %p1935_p1 = pnand %p1934_p3, %p1928_p0 }
  0x7d   : > { %1938 = shalt.err (!%p1935_p1)
}
  0x7e   : > { %s1939_s30 = scalar_lea.vmem %s2369_s6, 256  ;;  %s2103_s12 = smov [#allocation6]  }
  0x7f   : > { %p1940_p7 = scmp.ne.s32.totalorder %s2369_s6, %s1939_s30  ;;  %s1944_s3 = sshll.u32 %s2103_s12, 4  ;;  %s1945_s3 = int_to_ptr.vmem [resolvable:$false] %s1944_s3 }
  0x80   : > { %s1946_s28 = scalar_lea.vmem %s1945_s3, 512  ;;  %p1947_p10 = scmp.lt.s32.totalorder %s2369_s6, %s1945_s3 }
  0x81   : > { %p1942_p9 = pnand %p1940_p7, %p1926_p6  ;;  %p1948_p4 = scmp.lt.s32.totalorder %s1946_s28, %s1939_s30 }
  0x83   : > { %p1943_p5 = pneg %p1942_p9  ;;  %p1949_p2 = por %p1948_p4, %p1947_p10 }
  0x85   : > { %p1950_p8 = pnand %p1949_p2, %p1943_p5 }
  0x87   : > { %1953 = shalt.err (!%p1950_p8)
}
  0x88   : > { %1663 = dma.hbm_to_vmem [thread:$0]  (!%p2375_p11), %s2367_s9, 256, %s2369_s6, %s2408_s1, %s2808_s20, %s2807_s11, %s2806_s29  }
  0x89   : > { %p2810_p6 = scmp.ne.s32.totalorder %s2788_s18, 0 }
  0x8a   : > { %s2811_s4 = sld [smem:[#allocation18_spill]] (!%p2810_p6)  ;;  %s2812_s7 = sld [smem:[#allocation26_spill]] (!%p2810_p6) }
  0x8b   : > { %265 = sbr.rel (%p2810_p6) target bundleno = 981 (0x3d5), region = 32 }
  0x90   : > { %s2442_s19 = sand.u32 (!%p2810_p6), 1, %s2811_s4   ;;  %p2813_p0 = scmp.ne.s32.totalorder (!%p2810_p6), %s2812_s7, 0 }
  0x91   : > { %s1352_s10 = sshll.u32 (!%p2810_p6), %s2442_s19, 4  ;;  %s268_s15 = scalar_lea.sflag (!%p2810_p6), [#allocation7], %s2442_s19 }
  0x92   : > { %s271_s8 = scalar_lea.vmem [#allocation6], %s1352_s10 }
  0x93   : > { %2035 = dma.done.wait (%p2813_p0), %s268_s15, 256  }
  0x94   : > { %2037 = vsyncadd (%p2813_p0), %s268_s15, 4294967040  ;;  %s2814_s13 = sld [smem:[#allocation24_spill]]  ;;  %s2815_s16 = sld [smem:[#allocation16_spill]] }
  0x95   : > { %s2816_s6 = sld [smem:[#allocation25_spill]] }
  0x9a   : > { %s276_s9 = sand.u32 1, %s2814_s13   ;;  %s278_s18 = sand.u32 1, %s2815_s16  }
  0x9b   : > { %s2452_s29 = sshll.u32 %s278_s18, 4  ;;  %s277_s11 = scalar_lea.sflag [#allocation10], %s276_s9 }
  0x9c   : > { %s280_s20 = scalar_lea.vmem [#allocation9], %s2452_s29  ;;  %p2817_p11 = scmp.ne.s32.totalorder %s2816_s6, 0 }
  0x9e   : > { %2039 = dma.done.wait (%p2817_p11), %s277_s11, 512  }
  0x9f   : > { %2041 = vsyncadd (%p2817_p11), %s277_s11, 4294966784  ;;  %s289_s1 = scalar_lea.vmem [#allocation11], %s2452_s29  ;;  %s2460_s25 = scalar_lea.vmem [#allocation12], %s1352_s10 }
  0xa0   : > { %s2818_s5 = sld [smem:[#allocation19_spill]] }
  0xa6   : > { %p1356_p13 = scmp.ne.s32.totalorder %s2818_s5, 0 }
  0xa7   : > { %v330_v0 = vld [vmem:[%s271_s8] sm:$0xff] (!%p1356_p13)  ;;  %v331_v1 = vld [vmem:[%s271_s8 + $0x8] sm:$0xff] (!%p1356_p13)  ;;  %v2104_v4 = vmov (!%p1356_p13), 1.0   ;;  %v2105_v5 = vmov (!%p1356_p13), -inf   ;;  %v2106_v6 = vmov (!%p1356_p13), 0.0  }
  0xa8   : > { %329 = sbr.rel (%p1356_p13) target bundleno = 175 (0xaf), region = 48  ;;  %v332_v2 = vmul.f32 (!%p1356_p13), 0.35355338, %v330_v0  ;;  %v333_v3 = vmul.f32 (!%p1356_p13), 0.35355338, %v331_v1  ;;  %340 = vst [vmem:[#allocation5] sm:$0xff] (!%p1356_p13), %v2106_v6 }
  0xa9   : > { %336 = vst [vmem:[#allocation3 + $0x8] sm:$0x1] (!%p1356_p13), %v2104_v4  ;;  %337 = vst [vmem:[#allocation3 + $0x18] sm:$0x1] (!%p1356_p13), %v2104_v4 }
  0xaa   : > { %338 = vst [vmem:[#allocation4] sm:$0x1] (!%p1356_p13), %v2105_v5  ;;  %339 = vst [vmem:[#allocation4 + $0x1] sm:$0x1] (!%p1356_p13), %v2105_v5 }
  0xab   : > { %341 = vst [vmem:[#allocation5 + $0x8] sm:$0x1] (!%p1356_p13), %v2106_v6  ;;  %342 = vst [vmem:[#allocation5 + $0x10] sm:$0xff] (!%p1356_p13), %v2106_v6 }
  0xac   : > { %343 = vst [vmem:[#allocation5 + $0x18] sm:$0x1] (!%p1356_p13), %v2106_v6  ;;  %334 = vst [vmem:[#allocation2] sm:$0xff] (!%p1356_p13), %v332_v2 }
  0xad   : > { %335 = vst [vmem:[#allocation2 + $0x8] sm:$0xff] (!%p1356_p13), %v333_v3 }
  0xaf PF: > { %v350_v7 = vld [vmem:[%s280_s20] sm:$0xff]  ;;  %v351_v9 = vld [vmem:[%s280_s20 + $0x8] sm:$0xff]  ;;  %vm384_vm0 = vcmask 64512   ;;  %s2819_s23 = sld [smem:[#allocation19_spill]] }
  0xb0   : > { %352 = vxpose.xlu0.b32.start.end [1/1] (short) %v350_v7, 128  ;;  %v344_v49 = vld [vmem:[%s289_s1] sm:$0xff] }
  0xb3   : > { %v348_v8 = vld [vmem:[#allocation2] sm:$0xff] }
  0xb4   : > { %1465 = vmatprep.subr.mxu0 %v348_v8  ;;  %v349_v10 = vld [vmem:[#allocation2 + $0x8] sm:$0xff] }
  0xb5   : > { %1466 = vmatpush3.msra.mxu0 %v348_v8  ;;  %1491 = vmatprep.subr.mxu1 %v349_v10  ;;  %p1389_p12 = scmp.ne.s32.totalorder %s2819_s23, 1 }
  0xb6   : > { %1492 = vmatpush3.msra.mxu1 %v349_v10 }
  0xed   : > { %578 = vxpose.xlu0.b32.start.end [1/1] (short) %v351_v9, 128 }
 0x130   : > { %v368_v11 = vpop.trf.xlu0 }
 0x131   : > { %1467 = vmatprep.mubr.msk.f32.mxu0 %vm384_vm0, %v368_v11 }
 0x134   : > { %v369_v12 = vpop.trf.xlu0 }
 0x135   : > { %1468 = vmatmul.mubr.msk.f32.vlgmr.msra.gmra.mrb[0].mxu0 %vm384_vm0, %v369_v12  ;;  %v345_v12 = vld [vmem:[%s289_s1 + $0x8] sm:$0xff] }
 0x138   : > { %v370_v13 = vpop.trf.xlu0 }
 0x139   : > { %1470 = vmatprep.mubr.msk.f32.mxu0 %vm384_vm0, %v370_v13 }
 0x13c   : > { %v371_v14 = vpop.trf.xlu0 }
 0x13d   : > { %1471 = vmatmul.mubr.msk.f32.gmra.mrb[2].mxu0 %vm384_vm0, %v371_v14  ;;  %v857_v14 = vlaneseq }
 0x140   : > { %v372_v15 = vpop.trf.xlu0 }
 0x141   : > { %1473 = vmatprep.mubr.msk.f32.mxu0 %vm384_vm0, %v372_v15 }
 0x144   : > { %v373_v16 = vpop.trf.xlu0 }
 0x145   : > { %1474 = vmatmul.mubr.msk.f32.gmra.mrb[4].mxu0 %vm384_vm0, %v373_v16 }
 0x148   : > { %v374_v17 = vpop.trf.xlu0 }
 0x149   : > { %1476 = vmatprep.mubr.msk.f32.mxu0 %vm384_vm0, %v374_v17 }
 0x14c   : > { %v375_v18 = vpop.trf.xlu0 }
 0x14d   : > { %1477 = vmatmul.mubr.msk.f32.gmra.mrb[6].mxu0 %vm384_vm0, %v375_v18 }
 0x150   : > { %v376_v19 = vpop.trf.xlu0 }
 0x151   : > { %1479 = vmatprep.mubr.msk.f32.mxu0 %vm384_vm0, %v376_v19  ;;  %v858_v19 = vshrl.u32 %v857_v14, 7 }
 0x154   : > { %v377_v20 = vpop.trf.xlu0 }
 0x155   : > { %1480 = vmatmul.mubr.msk.f32.gmra.mrb[8].mxu0 %vm384_vm0, %v377_v20 }
 0x158   : > { %v378_v21 = vpop.trf.xlu0 }
 0x159   : > { %1482 = vmatprep.mubr.msk.f32.mxu0 %vm384_vm0, %v378_v21  ;;  %v2548_v21 = vld [vmem:[#allocation4] sm:$0x1] }
 0x15c   : > { %v379_v22 = vpop.trf.xlu0 }
 0x15d   : > { %1483 = vmatmul.mubr.msk.f32.gmra.mrb[10].mxu0 %vm384_vm0, %v379_v22 }
 0x160   : > { %v380_v23 = vpop.trf.xlu0 }
 0x161   : > { %1485 = vmatprep.mubr.msk.f32.mxu0 %vm384_vm0, %v380_v23  ;;  %v2550_v23 = vsub.s32 0, %v858_v19 }
 0x164   : > { %v381_v24 = vpop.trf.xlu0 }
 0x165   : > { %1486 = vmatmul.mubr.msk.f32.gmra.mrb[12].mxu0 %vm384_vm0, %v381_v24 }
 0x168   : > { %v382_v25 = vpop.trf.xlu0 }
 0x169   : > { %1488 = vmatprep.mubr.msk.f32.mxu0 %vm384_vm0, %v382_v25 }
 0x16c   : > { %v383_v26 = vpop.trf.xlu0 }
 0x16d   : > { %1489 = vmatmul.mubr.msk.f32.gmra.mrb[14].mxu0 %vm384_vm0, %v383_v26 }
 0x16e   : > { %1549 = vmatprep.mubr.f32.mxu0 %v344_v49 }
 0x170   : > { %v594_v27 = vpop.trf.xlu0 }
 0x171   : > { %1493 = vmatprep.mubr.msk.f32.mxu1 %vm384_vm0, %v594_v27 }
 0x174   : > { %v595_v28 = vpop.trf.xlu0 }
 0x175   : > { %1494 = vmatmul.mubr.msk.f32.vlgmr.msra.gmra.mrb[0].mxu1 %vm384_vm0, %v595_v28 }
 0x178   : > { %v596_v29 = vpop.trf.xlu0 }
 0x179   : > { %1496 = vmatprep.mubr.msk.f32.mxu1 %vm384_vm0, %v596_v29 }
 0x17c   : > { %v597_v30 = vpop.trf.xlu0 }
 0x17d   : > { %1497 = vmatmul.mubr.msk.f32.gmra.mrb[2].mxu1 %vm384_vm0, %v597_v30 }
 0x180   : > { %v598_v31 = vpop.trf.xlu0 }
 0x181   : > { %1499 = vmatprep.mubr.msk.f32.mxu1 %vm384_vm0, %v598_v31 }
 0x184   : > { %v599_v32 = vpop.trf.xlu0 }
 0x185   : > { %1500 = vmatmul.mubr.msk.f32.gmra.mrb[4].mxu1 %vm384_vm0, %v599_v32 }
 0x188   : > { %v600_v33 = vpop.trf.xlu0 }
 0x189   : > { %1502 = vmatprep.mubr.msk.f32.mxu1 %vm384_vm0, %v600_v33 }
 0x18c   : > { %v601_v34 = vpop.trf.xlu0 }
 0x18d   : > { %1503 = vmatmul.mubr.msk.f32.gmra.mrb[6].mxu1 %vm384_vm0, %v601_v34 }
 0x190   : > { %v602_v35 = vpop.trf.xlu0 }
 0x191   : > { %1505 = vmatprep.mubr.msk.f32.mxu1 %vm384_vm0, %v602_v35 }
 0x194   : > { %v603_v36 = vpop.trf.xlu0 }
 0x195   : > { %1506 = vmatmul.mubr.msk.f32.gmra.mrb[8].mxu1 %vm384_vm0, %v603_v36 }
 0x198   : > { %v604_v37 = vpop.trf.xlu0 }
 0x199   : > { %1508 = vmatprep.mubr.msk.f32.mxu1 %vm384_vm0, %v604_v37 }
 0x19c   : > { %v605_v38 = vpop.trf.xlu0 }
 0x19d   : > { %1509 = vmatmul.mubr.msk.f32.gmra.mrb[10].mxu1 %vm384_vm0, %v605_v38 }
 0x1a0   : > { %v606_v39 = vpop.trf.xlu0 }
 0x1a1   : > { %1511 = vmatprep.mubr.msk.f32.mxu1 %vm384_vm0, %v606_v39 }
 0x1a4   : > { %v607_v40 = vpop.trf.xlu0 }
 0x1a5   : > { %1512 = vmatmul.mubr.msk.f32.gmra.mrb[12].mxu1 %vm384_vm0, %v607_v40 }
 0x1a8   : > { %v608_v41 = vpop.trf.xlu0 }
 0x1a9   : > { %1514 = vmatprep.mubr.msk.f32.mxu1 %vm384_vm0, %v608_v41 }
 0x1ac   : > { %v609_v42 = vpop.trf.xlu0 }
 0x1ad   : > { %1515 = vmatmul.mubr.msk.f32.gmra.mrb[14].mxu1 %vm384_vm0, %v609_v42 }
 0x1ae   : > { %1584 = vmatprep.mubr.f32.mxu1 %v345_v12 }
 0x208   : > { %v2495_v43 = vpop.f32.mrb[0].mxu0 }
 0x209   : > { %v2497_v44 = vpop.f32.mrb[1].mxu0 }
 0x210   : > { %v2499_v45 = vpop.f32.mrb[2].mxu0 }
 0x211   : > { %v806_v46 = vmax.f32 %v2495_v43, %v2499_v45  ;;  %v2503_v47 = vpop.f32.mrb[3].mxu0 }
 0x212   : > { %v805_v48 = vmax.f32 %v2497_v44, %v2503_v47 }
 0x218   : > { %v2509_v50 = vpop.f32.mrb[4].mxu0 }
 0x219   : > { %v808_v51 = vmax.f32 %v806_v46, %v2509_v50  ;;  %v2512_v52 = vpop.f32.mrb[5].mxu0 }
 0x21a   : > { %v807_v53 = vmax.f32 %v805_v48, %v2512_v52 }
 0x220   : > { %v2515_v54 = vpop.f32.mrb[6].mxu0 }
 0x221   : > { %v810_v55 = vmax.f32 %v808_v51, %v2515_v54  ;;  %v2518_v56 = vpop.f32.mrb[7].mxu0 }
 0x222   : > { %v809_v57 = vmax.f32 %v807_v53, %v2518_v56 }
 0x228   : > { %v2521_v58 = vpop.f32.mrb[8].mxu0 }
 0x229   : > { %v812_v59 = vmax.f32 %v810_v55, %v2521_v58  ;;  %v2524_v60 = vpop.f32.mrb[9].mxu0 }
 0x22a   : > { %v811_v61 = vmax.f32 %v809_v57, %v2524_v60 }
 0x230   : > { %v2527_v62 = vpop.f32.mrb[10].mxu0 }
 0x231   : > { %v814_v63 = vmax.f32 %v812_v59, %v2527_v62  ;;  %v2530_v0 = vpop.f32.mrb[11].mxu0 }
 0x232   : > { %v813_v1 = vmax.f32 %v811_v61, %v2530_v0 }
 0x238   : > { %v2533_v2 = vpop.f32.mrb[12].mxu0 }
 0x239   : > { %v816_v3 = vmax.f32 %v814_v63, %v2533_v2  ;;  %v2536_v4 = vpop.f32.mrb[13].mxu0 }
 0x23a   : > { %v815_v5 = vmax.f32 %v813_v1, %v2536_v4 }
 0x240   : > { %v2539_v6 = vpop.f32.mrb[14].mxu0 }
 0x241   : > { %v818_v7 = vmax.f32 %v816_v3, %v2539_v6  ;;  %v569_v8 = vpop.f32.mrb[15].mxu0 }
 0x242   : > { %v817_v9 = vmax.f32 %v815_v5, %v569_v8 }
 0x244   : > { %v819_v10 = vmax.f32 %v817_v9, %v818_v7 }
 0x246   : > { %v820_v11 = vrot.slane %v819_v10, 4 }
 0x248   : > { %v821_v13 = vmax.f32 %v819_v10, %v820_v11  ;;  %v2544_v15 = vpop.f32.mrb[0].mxu1 }
 0x249   : > { %v2546_v16 = vpop.f32.mrb[1].mxu1 }
 0x24a   : > { %v822_v17 = vrot.slane %v821_v13, 2 }
 0x24c   : > { %v823_v18 = vmax.f32 %v821_v13, %v822_v17 }
 0x24e   : > { %v824_v20 = vrot.slane %v823_v18, 1 }
 0x250   : > { %v825_v22 = vmax.f32 %v823_v18, %v824_v20  ;;  %v2552_v24 = vpop.f32.mrb[2].mxu1 }
 0x251   : > { %v827_v25 = vmax.f32 %v2544_v15, %v2552_v24  ;;  %v2556_v26 = vpop.f32.mrb[3].mxu1 }
 0x252   : > { %v2559_v27 = vmax.f32 %v2548_v21, %v825_v22  ;;  %v826_v28 = vmax.f32 %v2546_v16, %v2556_v26 }
 0x254   : > { %v849_v29 = vsub.f32 %v2548_v21, %v2559_v27  ;;  %v860_v30 = vrot.slane %v2559_v27, %v2550_v23  ;;  %1145 = vst [vmem:[#allocation4] sm:$0x1] %v2559_v27 }
 0x256   : > { %v881_v31 = vsub.f32 %v569_v8, %v860_v30  ;;  %v867_v32 = vsub.f32 %v2497_v44, %v860_v30  ;;  %v868_v33 = vsub.f32 %v2495_v43, %v860_v30  ;;  %v869_v34 = vsub.f32 %v2503_v47, %v860_v30 }
 0x257   : > { %v870_v35 = vsub.f32 %v2499_v45, %v860_v30  ;;  %v871_v36 = vsub.f32 %v2512_v52, %v860_v30  ;;  %v872_v37 = vsub.f32 %v2509_v50, %v860_v30  ;;  %v873_v38 = vsub.f32 %v2518_v56, %v860_v30 }
 0x258   : > { %v927_v39 = vmul.f32 1.442695, %v881_v31  ;;  %v2575_v40 = vpop.f32.mrb[4].mxu1  ;;  %v899_v41 = vmul.f32 1.442695, %v867_v32  ;;  %v874_v42 = vsub.f32 %v2515_v54, %v860_v30  ;;  %v875_v44 = vsub.f32 %v2524_v60, %v860_v30 }
 0x259   : > { %v829_v43 = vmax.f32 %v827_v25, %v2575_v40  ;;  %v2580_v46 = vpop.f32.mrb[5].mxu1  ;;  %v901_v47 = vmul.f32 1.442695, %v868_v33  ;;  %v903_v45 = vmul.f32 1.442695, %v869_v34  ;;  %v876_v48 = vsub.f32 %v2521_v58, %v860_v30 }
 0x25a   : > { %1790 = vpow2.f32 %v927_v39  ;;  %v828_v49 = vmax.f32 %v826_v28, %v2580_v46  ;;  %v905_v50 = vmul.f32 1.442695, %v870_v35  ;;  %v907_v51 = vmul.f32 1.442695, %v871_v36 }
 0x25b   : > { %1792 = vpow2.f32 %v899_v41  ;;  %v909_v52 = vmul.f32 1.442695, %v872_v37  ;;  %v911_v53 = vmul.f32 1.442695, %v873_v38  ;;  %v877_v54 = vsub.f32 %v2530_v0, %v860_v30 }
 0x25c   : > { %1794 = vpow2.f32 %v901_v47  ;;  %v878_v55 = vsub.f32 %v2527_v62, %v860_v30  ;;  %v879_v56 = vsub.f32 %v2536_v4, %v860_v30  ;;  %v880_v57 = vsub.f32 %v2533_v2, %v860_v30 }
 0x25d   : > { %1796 = vpow2.f32 %v903_v45  ;;  %v913_v58 = vmul.f32 1.442695, %v874_v42  ;;  %v882_v59 = vsub.f32 %v2539_v6, %v860_v30  ;;  %v915_v60 = vmul.f32 1.442695, %v875_v44 }
 0x25e   : > { %1798 = vpow2.f32 %v905_v50  ;;  %v917_v63 = vmul.f32 1.442695, %v876_v48  ;;  %v919_v62 = vmul.f32 1.442695, %v877_v54  ;;  %v921_v2 = vmul.f32 1.442695, %v878_v55 }
 0x25f   : > { %1800 = vpow2.f32 %v907_v51  ;;  %v923_v4 = vmul.f32 1.442695, %v879_v56  ;;  %v925_v6 = vmul.f32 1.442695, %v880_v57  ;;  %v929_v8 = vmul.f32 1.442695, %v882_v59 }
 0x260   : > { %v2589_v61 = vpop.f32.mrb[6].mxu1  ;;  %1802 = vpow2.f32 %v909_v52  ;;  %v984_v59 = vld [vmem:[#allocation3 + $0x8] sm:$0x1] }
 0x261   : > { %v831_v1 = vmax.f32 %v829_v43, %v2589_v61  ;;  %v2592_v0 = vpop.f32.mrb[7].mxu1  ;;  %1804 = vpow2.f32 %v911_v53 }
 0x262   : > { %v830_v3 = vmax.f32 %v828_v49, %v2592_v0  ;;  %1806 = vpow2.f32 %v913_v58 }
 0x263   : > { %1808 = vpow2.f32 %v915_v60 }
 0x264   : > { %v1791_v5 = vpop.eup %1790  ;;  %1810 = vpow2.f32 %v917_v63 }
 0x265   : > { %v1793_v7 = vpop.eup %1792  ;;  %1812 = vpow2.f32 %v919_v62 }
 0x266   : > { %v1795_v9 = vpop.eup %1794  ;;  %1814 = vpow2.f32 %v921_v2 }
 0x267   : > { %v1797_v10 = vpop.eup %1796  ;;  %v1587_v11 = vpack.c.bf16 %v1795_v9, %v1793_v7  ;;  %1816 = vpow2.f32 %v923_v4 }
 0x268   : > { %v1799_v12 = vpop.eup %1798  ;;  %v2595_v13 = vpop.f32.mrb[8].mxu1  ;;  %1818 = vpow2.f32 %v925_v6 }
 0x269   : > { %v1801_v14 = vpop.eup %1800  ;;  %1588 = vmatprep.subr.bf16.mxu0 %v1587_v11  ;;  %v833_v17 = vmax.f32 %v831_v1, %v2595_v13  ;;  %v2598_v18 = vpop.f32.mrb[9].mxu1  ;;  %v1591_v19 = vpack.c.bf16 %v1799_v12, %v1797_v10  ;;  %1820 = vpow2.f32 %v929_v8 }
 0x26a   : > { %v1803_v20 = vpop.eup %1802  ;;  %1590 = vmatpush3.bf16.msra.mxu0 %v1587_v11  ;;  %v832_v22 = vmax.f32 %v830_v3, %v2598_v18  ;;  %v2616_v3 = vld [vmem:[#allocation4 + $0x1] sm:$0x1] }
 0x26b   : > { %v1805_v25 = vpop.eup %1804  ;;  %1592 = vmatprep.subr.bf16.mxu0 %v1591_v19  ;;  %v1595_v28 = vpack.c.bf16 %v1803_v20, %v1801_v14 }
 0x26c   : > { %v1807_v30 = vpop.eup %1806 }
 0x26d   : > { %v1809_v31 = vpop.eup %1808  ;;  %v1599_v32 = vpack.c.bf16 %v1807_v30, %v1805_v25 }
 0x26e   : > { %v1811_v33 = vpop.eup %1810  ;;  %1594 = vmatpush3.bf16.msra.mxu0 %v1591_v19 }
 0x26f   : > { %v1813_v34 = vpop.eup %1812  ;;  %1596 = vmatprep.subr.bf16.mxu0 %v1595_v28  ;;  %v1603_v35 = vpack.c.bf16 %v1811_v33, %v1809_v31 }
 0x270   : > { %v1815_v36 = vpop.eup %1814  ;;  %v2601_v37 = vpop.f32.mrb[10].mxu1 }
 0x271   : > { %v1817_v38 = vpop.eup %1816  ;;  %v835_v39 = vmax.f32 %v833_v17, %v2601_v37  ;;  %v2604_v41 = vpop.f32.mrb[11].mxu1  ;;  %v1607_v42 = vpack.c.bf16 %v1815_v36, %v1813_v34 }
 0x272   : > { %v1819_v44 = vpop.eup %1818  ;;  %1598 = vmatpush3.bf16.msra.mxu0 %v1595_v28  ;;  %v834_v43 = vmax.f32 %v832_v22, %v2604_v41 }
 0x273   : > { %v1821_v47 = vpop.eup %1820  ;;  %1600 = vmatprep.subr.bf16.mxu0 %v1599_v32  ;;  %v1611_v45 = vpack.c.bf16 %v1819_v44, %v1817_v38 }
 0x274   : > { %v1615_v48 = vpack.c.bf16 %v1821_v47, %v1791_v5 }
 0x276   : > { %1602 = vmatpush3.bf16.msra.mxu0 %v1599_v32 }
 0x277   : > { %1604 = vmatprep.subr.bf16.mxu0 %v1603_v35 }
 0x278   : > { %v2607_v49 = vpop.f32.mrb[12].mxu1 }
 0x279   : > { %v837_v50 = vmax.f32 %v835_v39, %v2607_v49  ;;  %v2610_v51 = vpop.f32.mrb[13].mxu1 }
 0x27a   : > { %1606 = vmatpush3.bf16.msra.mxu0 %v1603_v35  ;;  %v836_v52 = vmax.f32 %v834_v43, %v2610_v51 }
 0x27b   : > { %1608 = vmatprep.subr.bf16.mxu0 %v1607_v42 }
 0x27e   : > { %1610 = vmatpush3.bf16.msra.mxu0 %v1607_v42 }
 0x27f   : > { %1612 = vmatprep.subr.bf16.mxu0 %v1611_v45 }
 0x280   : > { %v2613_v53 = vpop.f32.mrb[14].mxu1 }
 0x281   : > { %v839_v54 = vmax.f32 %v837_v50, %v2613_v53  ;;  %v794_v55 = vpop.f32.mrb[15].mxu1 }
 0x282   : > { %1614 = vmatpush3.bf16.msra.mxu0 %v1611_v45  ;;  %v838_v56 = vmax.f32 %v836_v52, %v794_v55 }
 0x283   : > { %1616 = vmatprep.subr.bf16.mxu0 %v1615_v48 }
 0x284   : > { %v840_v57 = vmax.f32 %v838_v56, %v839_v54 }
 0x286   : > { %v841_v58 = vrot.slane %v840_v57, 4  ;;  %1618 = vmatpush3.bf16.msra.mxu0 %v1615_v48 }
 0x288   : > { %v842_v60 = vmax.f32 %v840_v57, %v841_v58 }
 0x289   : > { %1550 = vmatmul.mubr.f32.vlgmr.msra.gmra.mrb[16].mxu0 %v984_v59 }
 0x28a   : > { %v843_v63 = vrot.slane %v842_v60, 2 }
 0x28c   : > { %v844_v1 = vmax.f32 %v842_v60, %v843_v63 }
 0x28e   : > { %v845_v62 = vrot.slane %v844_v1, 1 }
 0x290   : > { %v846_v2 = vmax.f32 %v844_v1, %v845_v62 }
 0x292   : > { %v2619_v4 = vmax.f32 %v2616_v3, %v846_v2 }
 0x294   : > { %v850_v5 = vsub.f32 %v2616_v3, %v2619_v4  ;;  %v864_v6 = vrot.slane %v2619_v4, %v2550_v23  ;;  %1146 = vst [vmem:[#allocation4 + $0x1] sm:$0x1] %v2619_v4 }
 0x296   : > { %v897_v7 = vsub.f32 %v794_v55, %v864_v6  ;;  %v883_v8 = vsub.f32 %v2546_v16, %v864_v6  ;;  %v884_v9 = vsub.f32 %v2544_v15, %v864_v6  ;;  %v885_v10 = vsub.f32 %v2556_v26, %v864_v6 }
 0x297   : > { %v886_v11 = vsub.f32 %v2552_v24, %v864_v6  ;;  %v887_v12 = vsub.f32 %v2580_v46, %v864_v6  ;;  %v888_v14 = vsub.f32 %v2575_v40, %v864_v6  ;;  %v889_v17 = vsub.f32 %v2592_v0, %v864_v6 }
 0x298   : > { %v959_v19 = vmul.f32 1.442695, %v897_v7  ;;  %v931_v20 = vmul.f32 1.442695, %v883_v8  ;;  %v933_v22 = vmul.f32 1.442695, %v884_v9  ;;  %v890_v25 = vsub.f32 %v2589_v61, %v864_v6 }
 0x299   : > { %v935_v28 = vmul.f32 1.442695, %v885_v10  ;;  %v891_v16 = vsub.f32 %v2598_v18, %v864_v6  ;;  %v937_v15 = vmul.f32 1.442695, %v886_v11  ;;  %v939_v30 = vmul.f32 1.442695, %v887_v12 }
 0x29a   : > { %1822 = vpow2.f32 %v959_v19  ;;  %v941_v26 = vmul.f32 1.442695, %v888_v14  ;;  %v892_v24 = vsub.f32 %v2595_v13, %v864_v6  ;;  %v893_v46 = vsub.f32 %v2604_v41, %v864_v6  ;;  %v964_v10 = vld [vmem:[#allocation5 + $0x8] sm:$0x1]  ;;  %v963_v11 = vld [vmem:[#allocation5] sm:$0xff] }
 0x29b   : > { %1824 = vpow2.f32 %v931_v20  ;;  %v894_v40 = vsub.f32 %v2601_v37, %v864_v6  ;;  %v895_v0 = vsub.f32 %v2610_v51, %v864_v6  ;;  %v896_v31 = vsub.f32 %v2607_v49, %v864_v6 }
 0x29c   : > { %1826 = vpow2.f32 %v933_v22  ;;  %v943_v61 = vmul.f32 1.442695, %v889_v17  ;;  %v898_v18 = vsub.f32 %v2613_v53, %v864_v6  ;;  %v945_v32 = vmul.f32 1.442695, %v890_v25  ;;  %v986_v6 = vld [vmem:[#allocation3 + $0x18] sm:$0x1] }
 0x29d   : > { %1828 = vpow2.f32 %v935_v28  ;;  %v947_v33 = vmul.f32 1.442695, %v891_v16  ;;  %v949_v34 = vmul.f32 1.442695, %v892_v24  ;;  %v951_v13 = vmul.f32 1.442695, %v893_v46 }
 0x29e   : > { %1830 = vpow2.f32 %v937_v15  ;;  %v953_v35 = vmul.f32 1.442695, %v894_v40  ;;  %v955_v36 = vmul.f32 1.442695, %v895_v0  ;;  %v957_v38 = vmul.f32 1.442695, %v896_v31 }
 0x29f   : > { %1832 = vpow2.f32 %v939_v30  ;;  %v961_v41 = vmul.f32 1.442695, %v898_v18  ;;  %v851_v7 = vmul.f32 1.442695, %v849_v29  ;;  %v853_v25 = vmul.f32 1.442695, %v850_v5 }
 0x2a0   : > { %1834 = vpow2.f32 %v941_v26  ;;  %v966_v29 = vld [vmem:[#allocation5 + $0x18] sm:$0x1]  ;;  %v965_v28 = vld [vmem:[#allocation5 + $0x10] sm:$0xff] }
 0x2a1   : > { %1836 = vpow2.f32 %v943_v61 }
 0x2a2   : > { %1838 = vpow2.f32 %v945_v32 }
 0x2a3   : > { %1840 = vpow2.f32 %v947_v33 }
 0x2a4   : > { %v1823_v37 = vpop.eup %1822  ;;  %1842 = vpow2.f32 %v949_v34 }
 0x2a5   : > { %v1825_v39 = vpop.eup %1824  ;;  %1844 = vpow2.f32 %v951_v13 }
 0x2a6   : > { %v1827_v42 = vpop.eup %1826  ;;  %1846 = vpow2.f32 %v953_v35 }
 0x2a7   : > { %v1829_v44 = vpop.eup %1828  ;;  %v1619_v43 = vpack.c.bf16 %v1827_v42, %v1825_v39  ;;  %1848 = vpow2.f32 %v955_v36 }
 0x2a8   : > { %v1831_v47 = vpop.eup %1830  ;;  %1850 = vpow2.f32 %v957_v38 }
 0x2a9   : > { %v1833_v45 = vpop.eup %1832  ;;  %1620 = vmatprep.subr.bf16.mxu1 %v1619_v43  ;;  %v1623_v48 = vpack.c.bf16 %v1831_v47, %v1829_v44  ;;  %1852 = vpow2.f32 %v961_v41 }
 0x2aa   : > { %v1835_v49 = vpop.eup %1834  ;;  %1622 = vmatpush3.bf16.msra.mxu1 %v1619_v43  ;;  %1854 = vpow2.f32 %v851_v7 }
 0x2ab   : > { %v1837_v50 = vpop.eup %1836  ;;  %1624 = vmatprep.subr.bf16.mxu1 %v1623_v48  ;;  %v1627_v51 = vpack.c.bf16 %v1835_v49, %v1833_v45  ;;  %1856 = vpow2.f32 %v853_v25 }
 0x2ac   : > { %v1839_v52 = vpop.eup %1838 }
 0x2ad   : > { %v1841_v53 = vpop.eup %1840  ;;  %v1631_v54 = vpack.c.bf16 %v1839_v52, %v1837_v50 }
 0x2ae   : > { %v1843_v55 = vpop.eup %1842  ;;  %1626 = vmatpush3.bf16.msra.mxu1 %v1623_v48 }
 0x2af   : > { %v1845_v56 = vpop.eup %1844  ;;  %1628 = vmatprep.subr.bf16.mxu1 %v1627_v51  ;;  %v1635_v57 = vpack.c.bf16 %v1843_v55, %v1841_v53 }
 0x2b0   : > { %v1847_v58 = vpop.eup %1846 }
 0x2b1   : > { %v1849_v59 = vpop.eup %1848  ;;  %v1639_v60 = vpack.c.bf16 %v1847_v58, %v1845_v56 }
 0x2b2   : > { %v1851_v63 = vpop.eup %1850  ;;  %1630 = vmatpush3.bf16.msra.mxu1 %v1627_v51 }
 0x2b3   : > { %v1853_v1 = vpop.eup %1852  ;;  %1632 = vmatprep.subr.bf16.mxu1 %v1631_v54  ;;  %v1643_v62 = vpack.c.bf16 %v1851_v63, %v1849_v59 }
 0x2b4   : > { %v1647_v2 = vpack.c.bf16 %v1853_v1, %v1823_v37  ;;  %v1855_v8 = vpop.eup %1854 }
 0x2b5   : > { %v972_v9 = vrot.slane %v1855_v8, %v2550_v23  ;;  %v1857_v21 = vpop.eup %1856 }
 0x2b6   : > { %1634 = vmatpush3.bf16.msra.mxu1 %v1631_v54  ;;  %v976_v27 = vrot.slane %v1857_v21, %v2550_v23 }
 0x2b7   : > { %1636 = vmatprep.subr.bf16.mxu1 %v1635_v57  ;;  %v980_v12 = vmul.f32 %v972_v9, %v964_v10  ;;  %v979_v17 = vmul.f32 %v972_v9, %v963_v11 }
 0x2b8   : > { %v982_v16 = vmul.f32 %v976_v27, %v966_v29  ;;  %v981_v30 = vmul.f32 %v976_v27, %v965_v28 }
 0x2ba   : > { %1638 = vmatpush3.bf16.msra.mxu1 %v1635_v57 }
 0x2bb   : > { %1640 = vmatprep.subr.bf16.mxu1 %v1639_v60 }
 0x2be   : > { %1642 = vmatpush3.bf16.msra.mxu1 %v1639_v60 }
 0x2bf   : > { %1644 = vmatprep.subr.bf16.mxu1 %v1643_v62 }
 0x2c2   : > { %1646 = vmatpush3.bf16.msra.mxu1 %v1643_v62 }
 0x2c3   : > { %1648 = vmatprep.subr.bf16.mxu1 %v1647_v2 }
 0x2c6   : > { %1650 = vmatpush3.bf16.msra.mxu1 %v1647_v2 }
 0x2c9   : > { %1585 = vmatmul.mubr.f32.vlgmr.msra.gmra.mrb[16].mxu1 %v986_v6 }
 0x35c   : > { %v1551_v14 = vpop.f32.mrb[16].mxu0 }
 0x35d   : > { %v1138_v19 = vadd.f32 %v1551_v14, %v980_v12  ;;  %v1053_v20 = vpop.f32.mrb[17].mxu0 }
 0x35e   : > { %v1137_v22 = vadd.f32 %v1053_v20, %v979_v17 }
 0x35f   : > { %1142 = vst [vmem:[#allocation5 + $0x8] sm:$0x1] %v1138_v19 }
 0x360   : > { %1141 = vst [vmem:[#allocation5] sm:$0xff] %v1137_v22 }
 0x366   : > { %v1151_v40 = vld [vmem:[#allocation5 + $0x8] sm:$0x1] (!%p1389_p12) }
 0x367   : > { %1858 = vrcp.f32 (!%p1389_p12), %v1151_v40  ;;  %v1155_v5 = vld [vmem:[#allocation5] sm:$0xff] (!%p1389_p12) }
 0x371   : > { %v1859_v4 = vpop.eup (!%p1389_p12), %1858 }
 0x372   : > { %v1160_v31 = vrot.slane (!%p1389_p12), %v1859_v4, %v2550_v23 }
 0x374   : > { %v1165_v32 = vmul.f32 (!%p1389_p12), %v1160_v31, %v1155_v5 }
 0x376   : > { %1167 = vst [vmem:[%s2460_s25] sm:$0xff] (!%p1389_p12), %v1165_v32 }
 0x39a   : > { %1150 = sbr.rel (%p1389_p12) target bundleno = 951 (0x3b7), region = 52 }
 0x39c   : > { %v1586_v15 = vpop.f32.mrb[16].mxu1 }
 0x39d   : > { %v1140_v26 = vadd.f32 %v1586_v15, %v982_v16  ;;  %v1128_v24 = vpop.f32.mrb[17].mxu1 }
 0x39e   : > { %v1139_v46 = vadd.f32 %v1128_v24, %v981_v30 }
 0x39f   : > { %1144 = vst [vmem:[#allocation5 + $0x18] sm:$0x1] %v1140_v26 }
 0x3a0   : > { %1143 = vst [vmem:[#allocation5 + $0x10] sm:$0xff] %v1139_v46 }
 0x3a6   : > { %v1152_v3 = vld [vmem:[#allocation5 + $0x18] sm:$0x1] }
 0x3a7   : > { %1860 = vrcp.f32 %v1152_v3  ;;  %v1156_v61 = vld [vmem:[#allocation5 + $0x10] sm:$0xff] }
 0x3b1   : > { %v1861_v0 = vpop.eup %1860 }
 0x3b2   : > { %v1164_v18 = vrot.slane %v1861_v0, %v2550_v23 }
 0x3b4   : > { %v1166_v33 = vmul.f32 %v1164_v18, %v1156_v61 }
 0x3b6   : > { %1168 = vst [vmem:[%s2460_s25 + $0x8] sm:$0xff] %v1166_v33 }
 0x3b7 PF: > { %s2820_s30 = sld [smem:[#allocation21_spill]]  ;;  %s2821_s12 = sld [smem:[#allocation20_spill]] }
 0x3b8   : > { %s2822_s3 = sld [smem:[#allocation28_spill]]  ;;  %s1187_s7 = sshll.u32 %s2460_s25, 4  ;;  %s2657_s7 = int_to_ptr.vmem [resolvable:$true] %s1187_s7 }
 0x3b9   : > { %s2823_s13 = sld [smem:[#allocation32_spill]]  ;;  %s1170_s9 = scalar_lea.sflag [#allocation8], %s2442_s19 }
 0x3ba   : > { %s1954_s18 = scalar_lea.vmem %s2657_s7, 256  ;;  %s2107_s29 = smov [#allocation12]  }
 0x3bb   : > { %p1955_p3 = scmp.ne.s32.totalorder %s2657_s7, %s1954_s18  ;;  %s1958_s11 = sshll.u32 %s2107_s29, 4  ;;  %s1959_s11 = int_to_ptr.vmem [resolvable:$false] %s1958_s11 }
 0x3bc   : > { %s1960_s20 = scalar_lea.vmem %s1959_s11, 512  ;;  %p1961_p5 = scmp.lt.s32.totalorder %s2657_s7, %s1959_s11 }
 0x3bd   : > { %s1391_s28 = sshll.u32 %s2820_s30, 2  ;;  %p1962_p10 = scmp.lt.s32.totalorder %s1960_s20, %s1954_s18 }
 0x3be   : > { %s1184_s4 = sadd.s32 %s2821_s12, %s1391_s28  ;;  %p2825_p1 = scmp.ne.s32.totalorder %s2822_s3, 0 }
 0x3bf   : > { %s1392_s10 = sshll.u32 %s1184_s4, 7  ;;  %s2824_s6 = smov %s2823_s13 }
 0x3c0   : > { %s2662_s16 = scalar_lea.hbm %s2823_s13, %s1392_s10  ;;  %p1956_p7 = pnand %p1955_p3, %p2825_p1 }
 0x3c1   : > { %p1963_p4 = por %p1962_p10, %p1961_p5 }
 0x3c2   : > { %p1957_p9 = pneg %p1956_p7 }
 0x3c4   : > { %p1964_p2 = pnand %p1963_p4, %p1957_p9 }
 0x3c6   : > { %1967 = shalt.err (!%p1964_p2)
}
 0x3c7   : > { %s1968_s1 = scalar_lea.hbm %s2662_s16, 256  ;;  %s1972_s23 = scalar_lea.hbm %s2824_s6, 1024 }
 0x3c8   : > { %p1969_p8 = scmp.ne.s32.totalorder %s2662_s16, %s1968_s1  ;;  %p1973_p11 = scmp.lt.u32.totalorder %s2662_s16, %s2824_s6 }
 0x3c9   : > { %p1974_p13 = scmp.lt.u32.totalorder %s1972_s23, %s1968_s1  ;;  %p1976_p3 = scmp.lt.u32.totalorder %s1968_s1, %s2662_s16 }
 0x3ca   : > { %p1970_p6 = pnand %p1969_p8, %p2825_p1 }
 0x3cb   : > { %p1975_p12 = por %p1974_p13, %p1973_p11 }
 0x3cc   : > { %p1971_p0 = pneg %p1970_p6 }
 0x3cd   : > { %p1977_p7 = por %p1976_p3, %p1975_p12 }
 0x3cf   : > { %p1978_p9 = pnand %p1977_p7, %p1971_p0 }
 0x3d1   : > { %1981 = shalt.err (!%p1978_p9)
}
 0x3d2   : > { %s2108_s28 = smov 128   ;;  %s2109_s4 = smov 256  }
 0x3d3   : > { %s2110_s10 = smov 8  }
 0x3d4   : > { %1658 = dma.vmem_to_hbm [thread:$0]  (%p2825_p1), %s2657_s7, 256, %s2662_s16, %s1170_s9, %s2108_s28, %s2109_s4, %s2110_s10  }
 0x3d5 PF: > { %s2826_s15 = sld [smem:[#allocation17_spill]]  ;;  %p1675_p5 = scmp.ge.s32.totalorder %s2096_s24, 2 }
 0x3d6   : > { %s2827_s8 = sld [smem:[#allocation30_spill]] }
 0x3db   : > { %s1202_s13 = sand.u32 1, %s2826_s15  }
 0x3dc   : > { %p2828_p10 = scmp.ne.s32.totalorder %s2827_s8, 0  ;;  %s1203_s18 = scalar_lea.sflag [#allocation8], %s1202_s13 }
 0x3de   : > { %p1671_p4 = pnand %p1675_p5, %p2828_p10 }
 0x3e0   : > { %2043 = dma.done.wait (!%p1671_p4), %s1203_s18, 256  }
 0x3e1   : > { %2045 = vsyncadd (!%p1671_p4), %s1203_s18, 4294967040  ;;  %s22_s24 = sadd.s32 1, %s2096_s24   ;;  %s2830_s12 = sld [smem:[#allocation16_spill]] }
 0x3e2   : > { %p2693_p2 = scmp.ge.s32.totalorder %s22_s24, 10   ;;  %s2831_s15 = sld [smem:[#allocation18_spill]] }
 0x3e3   : > { %s2832_s19 = sld [smem:[#allocation22_spill]]  ;;  %s2833_s20 = sld [smem:[#allocation23_spill]] }
 0x3e4   : > { %s2834_s3 = sld [smem:[#allocation27_spill]]  ;;  %s2835_s23 = sld [smem:[#allocation29_spill]] }
 0x3e5   : > { %s2836_s13 = smov %s2056_s14  ;;  %s2837_s14 = smov %s2362_s27 }
 0x3e6   : > { %s2838_s16 = smov %s2068_s17  ;;  %s2839_s17 = smov %s2357_s22 }
 0x3e7   : > { %s2840_s18 = smov %s2084_s21  ;;  %s2841_s21 = smov %s2844_s26 }
 0x3e8   :  { %21 = sbr.rel (!%p2693_p2) target bundleno = 15 (0xf), region = 109 }
 0x3ea   : > { %s2842_s22 = smov %s2834_s3 }
 0x3ef   :  { %1208 = vsyncpa [#allocation7], 1 }
 0x3f0   :  { %1210 = vsyncpa [#allocation7 + $0x1], 1 }
 0x3f1   :  { %1211 = vsyncpa [#allocation10], 1 }
 0x3f2   :  { %1213 = vsyncpa [#allocation10 + $0x1], 1 }
 0x3f3   :  { %1214 = vsyncpa [#allocation8], 1 }
 0x3f4   :  { %1216 = vsyncpa [#allocation8 + $0x1], 1 }

</bundles_post_ra>
